<compile_context>
chip_gen: v5e
topology: v5e:2x2
jax: 0.10.0
libtpu: 0.0.40
codegen_flags: <defaults>
</compile_context>

<pallas_src>
import functools
import math

import jax
import jax.numpy as jnp
from jax.experimental import pallas as pl
from jax.experimental.pallas import tpu as pltpu


def _attention_kernel(x_ref, wq_ref, wk_ref, wv_ref, ctx_ref, k_ref, v_ref, *, tq):
    """Fused per-(batch, head) QKV projection + attention for one query tile.

    x_ref:   (1, S, E)     bf16 activations for batch b (resident across h, qi)
    wq_ref:  (1, E, D)     bf16 per-head Q weight (1/sqrt(D) pre-folded)
    wk_ref:  (1, E, D)     bf16 per-head K weight
    wv_ref:  (1, E, D)     bf16 per-head V weight
    ctx_ref: (1, 1, tq, D) bf16 output block: context rows for this query tile
    k_ref, v_ref: VMEM scratch (S, D) bf16; K/V for the current (b, h), computed
                  once at qi == 0 and reused for every query tile.
    """
    qi = pl.program_id(2)

    # ---- K/V projection: once per (batch, head), kept in VMEM scratch ----
    @pl.when(qi == 0)
    def _():
        x_full = x_ref[0]                                            # (S, E) bf16
        k_ref[...] = jnp.dot(x_full, wk_ref[0],
                             preferred_element_type=jnp.float32).astype(k_ref.dtype)
        v_ref[...] = jnp.dot(x_full, wv_ref[0],
                             preferred_element_type=jnp.float32).astype(v_ref.dtype)

    # ---- Q projection for this query tile (scale already folded into wq) ----
    row0 = pl.multiple_of(qi * tq, tq)
    x_tile = x_ref[0, pl.ds(row0, tq), :]                            # (tq, E) bf16
    q = jnp.dot(x_tile, wq_ref[0],
                preferred_element_type=jnp.float32).astype(jnp.bfloat16)   # (tq, D)

    # ---- scores + softmax (f32) ----
    s = jnp.einsum('qd,kd->qk', q, k_ref[...],
                   preferred_element_type=jnp.float32)               # (tq, S)
    s = s - jnp.max(s, axis=-1, keepdims=True)
    p = jnp.exp(s)
    attn = p * pl.reciprocal(jnp.sum(p, axis=-1, keepdims=True), approx=True)

    # ---- attn @ V (bf16 MXU operands, f32 accumulation) ----
    ctx = jnp.dot(attn.astype(jnp.bfloat16), v_ref[...],
                  preferred_element_type=jnp.float32)                # (tq, D)
    ctx_ref[0, 0] = ctx.astype(ctx_ref.dtype)


def _fc_out_kernel(x_ref, w_ref, b_ref, o_ref):
    """fc_out over one tile of B*S rows: (tm, E) @ (E, E) + bias."""
    y = jnp.dot(x_ref[...], w_ref[...], preferred_element_type=jnp.float32)
    o_ref[...] = (y + b_ref[...]).astype(o_ref.dtype)


def _vmem_limit_bytes():
    """Per-generation VMEM budget: ~3/4 of physical capacity, capped at 100 MiB."""
    try:
        cap = pltpu.get_tpu_info().vmem_capacity_bytes
        return int(min(cap * 3 // 4, 100 * 1024 * 1024))
    except Exception:
        return 32 * 1024 * 1024   # conservative fallback, plenty for demo shapes


def self_attention_forward(x, params, heads_num):
    """Forward pass of SelfAttention (mask=None path). x: [B, S, E] float32."""
    B, S, E = x.shape
    H = heads_num
    D = E // H
    assert D * H == E, 'embed_size must be divisible by heads_num'

    # Query-tile size: full S for short sequences, 256-row tiles otherwise.
    tq = S if S <= 256 else 256
    assert S % tq == 0, "demo wrapper assumes S % tq == 0"
    n_q = S // tq

    # ---- weight prep (once, outside the kernel) ----
    # nn.Linear stores [out, in]; transpose so y = x @ W^T.  Fold 1/sqrt(D) into
    # the Q weights, split head-major (each head's D columns are a lane-0-aligned
    # block), cast MXU operands to bf16.
    def per_head(w):                      # [out, in] -> (H, E_in, D)
        return w.T.reshape(E, H, D).transpose(1, 0, 2).astype(jnp.bfloat16)

    scale = 1.0 / math.sqrt(D)
    wq = per_head(params["w_q"] * scale)
    wk = per_head(params["w_k"])
    wv = per_head(params["w_v"])
    x_bf16 = x.astype(jnp.bfloat16)

    vmem_limit = _vmem_limit_bytes()

    # ---- Kernel 1: fused QKV projection + attention, grid over (B, H, q-tiles) ----
    attn_flops = B * H * (3 * 2 * S * E * D      # Q/K/V projections
                          + 4 * S * S * D)       # scores + attn@V
    ctx = pl.pallas_call(
        functools.partial(_attention_kernel, tq=tq),
        out_shape=jax.ShapeDtypeStruct((B, H, S, D), jnp.bfloat16),
        grid_spec=pltpu.PrefetchScalarGridSpec(
            num_scalar_prefetch=0,
            grid=(B, H, n_q),
            in_specs=[
                pl.BlockSpec((1, S, E), lambda b, h, q: (b, 0, 0)),   # x (resident per b)
                pl.BlockSpec((1, E, D), lambda b, h, q: (h, 0, 0)),   # Wq (scaled), per head
                pl.BlockSpec((1, E, D), lambda b, h, q: (h, 0, 0)),   # Wk, per head
                pl.BlockSpec((1, E, D), lambda b, h, q: (h, 0, 0)),   # Wv, per head
            ],
            out_specs=pl.BlockSpec((1, 1, tq, D), lambda b, h, q: (b, h, q, 0)),
            scratch_shapes=[pltpu.VMEM((S, D), jnp.bfloat16),         # K for current (b, h)
                            pltpu.VMEM((S, D), jnp.bfloat16)],        # V for current (b, h)
        ),
        compiler_params=pltpu.CompilerParams(
            dimension_semantics=("parallel", "parallel", "arbitrary"),
            vmem_limit_bytes=vmem_limit,
        ),
        cost_estimate=pl.CostEstimate(
            flops=attn_flops,
            transcendentals=B * H * S * S,
            bytes_accessed=2 * (x_bf16.size + wq.size + wk.size + wv.size + B * H * S * D),
        ),
    )(x_bf16, wq, wk, wv)

    # ---- the module's RAW reshape [B, H, S, D] -> [B, S, H*D], done by XLA ----
    # (This is exactly `output.reshape(batch, seq, H*D)` from the reference — a raw
    #  row-major regroup that mixes heads and sequence positions, not the usual
    #  transpose-then-reshape.  Doing it here keeps all relayout traffic out of the
    #  kernels.)
    before_linear = ctx.reshape(B, S, E)
    # TODO(synk): reference prints the pre-fc_out tensor here; debug print omitted.
    rows = before_linear.reshape(B * S, E)                           # fold B*S rows

    # ---- Kernel 2: fc_out over folded (B*S, E) rows, weights resident in VMEM ----
    wo_t = params["fc_out_w"].T.astype(jnp.bfloat16)                 # (E_in, E_out)
    bo = params["fc_out_b"].reshape(1, E).astype(jnp.float32)
    n_rows = B * S
    tm = n_rows if n_rows <= 256 else 256
    assert n_rows % tm == 0, "demo wrapper assumes (B*S) % tm == 0"

    y = pl.pallas_call(
        _fc_out_kernel,
        out_shape=jax.ShapeDtypeStruct((n_rows, E), jnp.float32),
        grid_spec=pltpu.PrefetchScalarGridSpec(
            num_scalar_prefetch=0,
            grid=(n_rows // tm,),
            in_specs=[
                pl.BlockSpec((tm, E), lambda i: (i, 0)),             # activation row tile
                # Grid-invariant weight/bias: whole-array, single VMEM copy
                # (no double-buffering).
                pl.BlockSpec(memory_space=pltpu.MemorySpace.VMEM),
                pl.BlockSpec(memory_space=pltpu.MemorySpace.VMEM),
            ],
            out_specs=pl.BlockSpec((tm, E), lambda i: (i, 0)),       # lane-dense output
        ),
        compiler_params=pltpu.CompilerParams(
            dimension_semantics=("parallel",),
            vmem_limit_bytes=vmem_limit,
        ),
        cost_estimate=pl.CostEstimate(
            flops=2 * n_rows * E * E,
            transcendentals=0,
            bytes_accessed=2 * rows.size + 2 * wo_t.size + 4 * bo.size + 4 * n_rows * E,
        ),
    )(rows, wo_t, bo)

    return y.reshape(B, S, E)


def _reference_forward(x, params, heads_num):
    """Pure-JAX f32 reference mirroring the PyTorch forward exactly (mask=None)."""
    B, S, E = x.shape
    D = E // heads_num
    q = (x @ params["w_q"].T).reshape(B, S, heads_num, D)
    k = (x @ params["w_k"].T).reshape(B, S, heads_num, D)
    v = (x @ params["w_v"].T).reshape(B, S, heads_num, D)
    qk = jnp.einsum("nqhd,nkhd->nhqk", q, k) / math.sqrt(D)
    attn = jax.nn.softmax(qk, axis=-1)
    o = jnp.einsum("bhis,bshd->bhid", attn, v)
    o = o.reshape(B, S, heads_num * D)            # RAW reshape, as in the module
    return o @ params["fc_out_w"].T + params["fc_out_b"]


if __name__ == "__main__":
    # Small shapes consistent with the module's forward: x [B, S, E].
    B, S, E, H = 2, 8, 32, 4

    key = jax.random.PRNGKey(0)
    kx, kq, kk, kv, kw, kb = jax.random.split(key, 6)

    x = jax.random.normal(kx, (B, S, E), dtype=jnp.float32)
    params = {
        "w_q": jax.random.normal(kq, (E, E), dtype=jnp.float32) * 0.1,   # [out, in]
        "w_k": jax.random.normal(kk, (E, E), dtype=jnp.float32) * 0.1,
        "w_v": jax.random.normal(kv, (E, E), dtype=jnp.float32) * 0.1,
        "fc_out_w": jax.random.normal(kw, (E, E), dtype=jnp.float32) * 0.1,
        "fc_out_b": jax.random.normal(kb, (E,), dtype=jnp.float32) * 0.1,
    }

    out = self_attention_forward(x, params, H)
    out = jax.block_until_ready(out)

    ref = _reference_forward(x, params, H)
    assert out.shape == (B, S, E)
    # bf16 MXU operands (f32 accumulation) vs. an all-f32 reference -> relaxed tol.
    assert jnp.allclose(out, ref, atol=2e-2, rtol=2e-2), (
        f"mismatch vs reference (max abs err = {jnp.max(jnp.abs(out - ref)):.3e})")
    print("KERNEL_OK")
</pallas_src>

<mosaic_0001>
module attributes {stable_mosaic.version = 11 : i64} {
  func.func @_attention_kernel(%arg0: i32, %arg1: i32, %arg2: i32, %arg3: memref<1x8x32xbf16, #tpu.memory_space<vmem>>, %arg4: memref<1x32x8xbf16, #tpu.memory_space<vmem>>, %arg5: memref<1x32x8xbf16, #tpu.memory_space<vmem>>, %arg6: memref<1x32x8xbf16, #tpu.memory_space<vmem>>, %arg7: memref<1x1x8x8xbf16, #tpu.memory_space<vmem>>, %arg8: memref<8x8xbf16, #tpu.memory_space<vmem>>, %arg9: memref<8x8xbf16, #tpu.memory_space<vmem>>) attributes {dimension_semantics = [#tpu.dimension_semantics<parallel>, #tpu.dimension_semantics<parallel>, #tpu.dimension_semantics<arbitrary>], iteration_bounds = array<i64: 2, 4, 1>, scalar_prefetch = 0 : i64, scratch_operands = 2 : i64, tpu.core_type = #tpu.core_type<tc>, window_params = [{transform_indices = @transform_0, window_bounds = array<i64: 1, 8, 32>}, {transform_indices = @transform_1, window_bounds = array<i64: 1, 32, 8>}, {transform_indices = @transform_2, window_bounds = array<i64: 1, 32, 8>}, {transform_indices = @transform_3, window_bounds = array<i64: 1, 32, 8>}, {transform_indices = @transform_4, window_bounds = array<i64: 1, 1, 8, 8>}]} {
    %c0_i32 = arith.constant 0 : i32
    %0 = arith.cmpi eq, %arg2, %c0_i32 : i32
    %1 = arith.extui %0 : i1 to i32
    %c0_i32_0 = arith.constant 0 : i32
    %2 = arith.cmpi ne, %1, %c0_i32_0 : i32
    scf.if %2 {
      %c0_17 = arith.constant 0 : index
      %c0_18 = arith.constant 0 : index
      %c0_19 = arith.constant 0 : index
      %31 = vector.load %arg3[%c0_17, %c0_18, %c0_19] : memref<1x8x32xbf16, #tpu.memory_space<vmem>>, vector<1x8x32xbf16>
      %32 = vector.shape_cast %31 : vector<1x8x32xbf16> to vector<8x32xbf16>
      %c0_20 = arith.constant 0 : index
      %c0_21 = arith.constant 0 : index
      %c0_22 = arith.constant 0 : index
      %33 = vector.load %arg5[%c0_20, %c0_21, %c0_22] : memref<1x32x8xbf16, #tpu.memory_space<vmem>>, vector<1x32x8xbf16>
      %34 = vector.shape_cast %33 : vector<1x32x8xbf16> to vector<32x8xbf16>
      %cst_23 = arith.constant dense<0.000000e+00> : vector<8x8xf32>
      %35 = tpu.matmul %32, %34, %cst_23 {dimension_numbers = #tpu.dot_dimension_numbers<[1], [0], [0], [1], [0, 0, 1, 1], [], []>} : vector<8x32xbf16>, vector<32x8xbf16>, vector<8x8xf32> -> vector<8x8xf32>
      %36 = arith.truncf %35 : vector<8x8xf32> to vector<8x8xbf16>
      %c0_24 = arith.constant 0 : index
      %c0_25 = arith.constant 0 : index
      %37 = vector.load %arg8[%c0_24, %c0_25] : memref<8x8xbf16, #tpu.memory_space<vmem>>, vector<8x8xbf16>
      tpu.vector_store %arg8[%c0_24, %c0_25], %36 {strides = array<i32>} : memref<8x8xbf16, #tpu.memory_space<vmem>>, vector<8x8xbf16>,
      %c0_26 = arith.constant 0 : index
      %c0_27 = arith.constant 0 : index
      %c0_28 = arith.constant 0 : index
      %38 = vector.load %arg6[%c0_26, %c0_27, %c0_28] : memref<1x32x8xbf16, #tpu.memory_space<vmem>>, vector<1x32x8xbf16>
      %39 = vector.shape_cast %38 : vector<1x32x8xbf16> to vector<32x8xbf16>
      %cst_29 = arith.constant dense<0.000000e+00> : vector<8x8xf32>
      %40 = tpu.matmul %32, %39, %cst_29 {dimension_numbers = #tpu.dot_dimension_numbers<[1], [0], [0], [1], [0, 0, 1, 1], [], []>} : vector<8x32xbf16>, vector<32x8xbf16>, vector<8x8xf32> -> vector<8x8xf32>
      %41 = arith.truncf %40 : vector<8x8xf32> to vector<8x8xbf16>
      %c0_30 = arith.constant 0 : index
      %c0_31 = arith.constant 0 : index
      %42 = vector.load %arg9[%c0_30, %c0_31] : memref<8x8xbf16, #tpu.memory_space<vmem>>, vector<8x8xbf16>
      tpu.vector_store %arg9[%c0_30, %c0_31], %41 {strides = array<i32>} : memref<8x8xbf16, #tpu.memory_space<vmem>>, vector<8x8xbf16>,
    } else {
    }
    %c8_i32 = arith.constant 8 : i32
    %3 = arith.muli %arg2, %c8_i32 : i32
    %4 = tpu.assume_multiple %3, 8 : i32
    %c0 = arith.constant 0 : index
    %5 = arith.index_cast %4 : i32 to index
    %c0_1 = arith.constant 0 : index
    %6 = vector.load %arg3[%c0, %5, %c0_1] : memref<1x8x32xbf16, #tpu.memory_space<vmem>>, vector<1x8x32xbf16>
    %7 = vector.shape_cast %6 : vector<1x8x32xbf16> to vector<8x32xbf16>
    %c0_2 = arith.constant 0 : index
    %c0_3 = arith.constant 0 : index
    %c0_4 = arith.constant 0 : index
    %8 = vector.load %arg4[%c0_2, %c0_3, %c0_4] : memref<1x32x8xbf16, #tpu.memory_space<vmem>>, vector<1x32x8xbf16>
    %9 = vector.shape_cast %8 : vector<1x32x8xbf16> to vector<32x8xbf16>
    %cst = arith.constant dense<0.000000e+00> : vector<8x8xf32>
    %10 = tpu.matmul %7, %9, %cst {dimension_numbers = #tpu.dot_dimension_numbers<[1], [0], [0], [1], [0, 0, 1, 1], [], []>} : vector<8x32xbf16>, vector<32x8xbf16>, vector<8x8xf32> -> vector<8x8xf32>
    %11 = arith.truncf %10 : vector<8x8xf32> to vector<8x8xbf16>
    %c0_5 = arith.constant 0 : index
    %c0_6 = arith.constant 0 : index
    %12 = vector.load %arg8[%c0_5, %c0_6] : memref<8x8xbf16, #tpu.memory_space<vmem>>, vector<8x8xbf16>
    "tpu.trace_start"() <{level = 10 : i32, message = "qd,kd->qk"}> : () -> ()
    %cst_7 = arith.constant dense<0.000000e+00> : vector<8x8xf32>
    %13 = tpu.matmul %11, %12, %cst_7 {dimension_numbers = #tpu.dot_dimension_numbers<[1], [1], [0], [0], [0, 0, 1, 0], [], []>} : vector<8x8xbf16>, vector<8x8xbf16>, vector<8x8xf32> -> vector<8x8xf32>
    "tpu.trace_stop"() : () -> ()
    %cst_8 = arith.constant dense<0xFF800000> : vector<8xf32>
    %14 = vector.multi_reduction <maximumf>, %13, %cst_8 [1] : vector<8x8xf32> to vector<8xf32>
    %15 = vector.shape_cast %14 : vector<8xf32> to vector<8x1xf32>
    %16 = vector.broadcast %15 : vector<8x1xf32> to vector<8x8xf32>
    %17 = arith.subf %13, %16 : vector<8x8xf32>
    %18 = math.exp %17 : vector<8x8xf32>
    %cst_9 = arith.constant dense<0.000000e+00> : vector<8xf32>
    %19 = vector.multi_reduction <add>, %18, %cst_9 [1] : vector<8x8xf32> to vector<8xf32>
    %20 = vector.shape_cast %19 : vector<8xf32> to vector<8x1xf32>
    %21 = tpu.reciprocal %20 {approx = true} : vector<8x1xf32> -> vector<8x1xf32>
    %22 = vector.broadcast %21 : vector<8x1xf32> to vector<8x8xf32>
    %23 = arith.mulf %18, %22 : vector<8x8xf32>
    %24 = arith.truncf %23 : vector<8x8xf32> to vector<8x8xbf16>
    %c0_10 = arith.constant 0 : index
    %c0_11 = arith.constant 0 : index
    %25 = vector.load %arg9[%c0_10, %c0_11] : memref<8x8xbf16, #tpu.memory_space<vmem>>, vector<8x8xbf16>
    %cst_12 = arith.constant dense<0.000000e+00> : vector<8x8xf32>
    %26 = tpu.matmul %24, %25, %cst_12 {dimension_numbers = #tpu.dot_dimension_numbers<[1], [0], [0], [1], [0, 0, 1, 1], [], []>} : vector<8x8xbf16>, vector<8x8xbf16>, vector<8x8xf32> -> vector<8x8xf32>
    %27 = arith.truncf %26 : vector<8x8xf32> to vector<8x8xbf16>
    %c0_13 = arith.constant 0 : index
    %c0_14 = arith.constant 0 : index
    %c0_15 = arith.constant 0 : index
    %c0_16 = arith.constant 0 : index
    %28 = vector.load %arg7[%c0_13, %c0_14, %c0_15, %c0_16] : memref<1x1x8x8xbf16, #tpu.memory_space<vmem>>, vector<1x1x8x8xbf16>
    %29 = vector.shape_cast %28 : vector<1x1x8x8xbf16> to vector<8x8xbf16>
    %30 = vector.shape_cast %27 : vector<8x8xbf16> to vector<1x1x8x8xbf16>
    tpu.vector_store %arg7[%c0_13, %c0_14, %c0_15, %c0_16], %30 {strides = array<i32>} : memref<1x1x8x8xbf16, #tpu.memory_space<vmem>>, vector<1x1x8x8xbf16>,
    return
  }
  func.func @transform_0(%arg0: i32, %arg1: i32, %arg2: i32) -> (i32, i32, i32) {
    %c0_i32 = arith.constant 0 : i32
    %c0_i32_0 = arith.constant 0 : i32
    %c0_i32_1 = arith.constant 0 : i32
    return %arg0, %c0_i32, %c0_i32_0 : i32, i32, i32
  }
  func.func @transform_1(%arg0: i32, %arg1: i32, %arg2: i32) -> (i32, i32, i32) {
    %c0_i32 = arith.constant 0 : i32
    %c0_i32_0 = arith.constant 0 : i32
    %c0_i32_1 = arith.constant 0 : i32
    return %arg1, %c0_i32, %c0_i32_0 : i32, i32, i32
  }
  func.func @transform_2(%arg0: i32, %arg1: i32, %arg2: i32) -> (i32, i32, i32) {
    %c0_i32 = arith.constant 0 : i32
    %c0_i32_0 = arith.constant 0 : i32
    %c0_i32_1 = arith.constant 0 : i32
    return %arg1, %c0_i32, %c0_i32_0 : i32, i32, i32
  }
  func.func @transform_3(%arg0: i32, %arg1: i32, %arg2: i32) -> (i32, i32, i32) {
    %c0_i32 = arith.constant 0 : i32
    %c0_i32_0 = arith.constant 0 : i32
    %c0_i32_1 = arith.constant 0 : i32
    return %arg1, %c0_i32, %c0_i32_0 : i32, i32, i32
  }
  func.func @transform_4(%arg0: i32, %arg1: i32, %arg2: i32) -> (i32, i32, i32, i32) {
    %c0_i32 = arith.constant 0 : i32
    %c0_i32_0 = arith.constant 0 : i32
    return %arg0, %arg1, %arg2, %c0_i32 : i32, i32, i32, i32
  }
}

</mosaic_0001>

<bundles_post_ra>
// kernel: tpu_custom_call.1
= control target key start
LH: loop header
LB: loop body
LE: loop exit
PB: predicated region body
PF: predicated region fallthrough
CT: control target
= control target key end

     0   :  { %9 = vsyncpa [#allocation5], 0  ;;  %s978_s0 = inlined_call_operand.vmem [shape: bf16[2,8,32], index: 0, kind: input, shape index: {}]   ;;  %s979_s1 = inlined_call_operand.vmem [shape: bf16[4,32,8], index: 1, kind: input, shape index: {}]   ;;  %s980_s2 = inlined_call_operand.vmem [shape: bf16[4,32,8], index: 2, kind: input, shape index: {}]   ;;  %s981_s3 = inlined_call_operand.vmem [shape: bf16[4,32,8], index: 3, kind: input, shape index: {}]   ;;  %s982_s4 = inlined_call_operand.hbm [shape: bf16[2,4,8,8], index: 4, kind: output, shape index: {}]  }
   0x1   :  { %11 = vsyncpa [#allocation5 + $0x1], 0  ;;  %s831_s15 = smov 0   ;;  %s833_s16 = smov 0  }
   0x2   :  { %s835_s17 = smov 0   ;;  %s837_s18 = smov 0  }
   0x3   :  { %s839_s19 = smov 0   ;;  %s841_s20 = smov 0  }
   0x4   :  { %s843_s21 = smov 0   ;;  %s845_s22 = smov 0  }
   0x5 LB: > { %s579_s23 = sadd.s32 4294967295, %s804_s22   ;;  %s580_s24 = sadd.s32 4294967294, %s804_s22   ;;  %s804_s22 = sphi %s845_s22, %s17_s22   ;;  %s800_s21 = sphi %s843_s21, %s991_s21   ;;  %s796_s20 = sphi %s841_s20, %s990_s20   ;;  %s792_s19 = sphi %s839_s19, %s989_s19   ;;  %s788_s18 = sphi %s837_s18, %s988_s18   ;;  %s784_s17 = sphi %s835_s17, %s987_s17   ;;  %s780_s16 = sphi %s833_s16, %s986_s16   ;;  %s776_s15 = sphi %s831_s15, %s985_s15  }
   0x6   : > { %s32_s25 = sadd.s32 1, %s796_s20  ;;  %s36_s26 = sadd.s32 1, %s800_s21 }
   0x7   : > { %p34_p0 = scmp.ge.s32.totalorder %s32_s25, 4  ;;  %p161_p1 = scmp.ne.s32.totalorder %s784_s17, %s780_s16 }
   0x8   : > { %p162_p2 = scmp.eq.s32.totalorder %s579_s23, 7  ;;  %p167_p5 = scmp.ne.s32.totalorder %s780_s16, %s776_s15 }
   0x9   : > { %s993_s25 = smov (%p34_p0, %s32_s25), 0  ;;  %s995_s26 = smov (!%p34_p0, %s36_s26), %s800_s21 }
   0xa   : > { %s145_s27 = ssub.s32 %s796_s20, %s993_s25  ;;  %p882_p3 = por %p162_p2, %p161_p1 }
   0xb   : > { %p38_p4 = scmp.ge.s32.totalorder %s995_s26, 2  ;;  %p168_p6 = scmp.eq.s32.totalorder %s580_s24, 7 }
   0xc   : > { %p583_p7 = scmp.ge.s32.totalorder %s804_s22, 1  ;;  %p217_p9 = scmp.lt.s32.totalorder %s804_s22, 9 }
   0xd   : > { %s997_s26 = smov (%p38_p4, %s995_s26), 0  ;;  %p891_p8 = por %p168_p6, %p167_p5 }
   0xe   : > { %s144_s30 = ssub.s32 %s800_s21, %s997_s26  ;;  %s151_s5 = sadd.s32 1, %s784_s17 }
   0xf   : > { %s146_s6 = sor.u32 %s145_s27, %s144_s30  ;;  %p218_p10 = pnand %p583_p7, %p217_p9 }
  0x10   : > { %p149_p11 = scmp.eq.s32.totalorder %s146_s6, 0  ;;  %p261_p12 = scmp.lt.s32.totalorder (!%p218_p10), %s788_s18, 3 }
  0x11   : > { %221 = sbr.rel (%p218_p10) target bundleno = 700 (0x2bc), region = 36  ;;  %p257_p13 = scmp.lt.s32.totalorder (!%p218_p10), %s792_s19, 1 }
  0x12   : > { %s900_s7 = scalar_select %p149_p11, %s784_s17, %s151_s5  }
  0x16   : > { %s262_s8 = scalar_select %p261_p12, %s788_s18, 3  ;;  %vm298_vm0 = vcmask 261120   ;;  %vm316_vm1 = vcmask 60416   ;;  %vm390_vm2 = vcmask 64512   ;;  %vm426_vm3 = vcmask 1043456  }
  0x17   : > { %s258_s9 = scalar_select %p257_p13, %s792_s19, 1 }
  0x18   : > { %s906_s10 = sshll.u32 %s262_s8, 4 }
  0x19   : > { %s270_s13 = scalar_lea.vmem %s980_s2, %s906_s10  ;;  %s265_s24 = scalar_lea.vmem %s979_s1, %s906_s10 }
  0x1a   : > { %v630_v0 = vld [vmem:[%s270_s13 + $0x8] sm:$0xff]  ;;  %s585_s27 = sshll.u32 %s258_s9, 2  ;;  %v629_v2 = vld [vmem:[%s270_s13] sm:$0xff]  ;;  %s275_s11 = scalar_lea.vmem %s981_s3, %s906_s10 }
  0x1b   : > { %v634_v1 = vld [vmem:[%s265_s24 + $0x8] sm:$0xff]  ;;  %308 = vmatpush.bf16.msra.mxu0 %v630_v0  ;;  %v633_v3 = vld [vmem:[%s265_s24] sm:$0xff]  ;;  %s260_s6 = scalar_lea.vmem %s978_s0, %s585_s27  ;;  %s622_s10 = sshll.u32 %s792_s19, 2 }
  0x1c   : > { %381 = vmatpush.bf16.msra.mxu2 %v634_v1  ;;  %v281_v4 = vld [vmem:[%s260_s6] sm:$0xf]  ;;  %v632_v14 = vld [vmem:[%s275_s11 + $0x8] sm:$0xff]  ;;  %s458_s12 = sadd.s32 %s788_s18, %s622_s10  ;;  %s254_s13 = sand.u32 1, %s780_s16  }
  0x1d   : > { %v354_v5 = vld [vmem:[%s260_s6] sm:$0xf]  ;;  %340 = vmatpush.bf16.msra.mxu1 %v632_v14  ;;  %s623_s14 = sshll.u32 %s458_s12, 2  ;;  %s584_s23 = sshll.u32 %s254_s13, 2 }
  0x1e   : > { %v631_v15 = vld [vmem:[%s275_s11] sm:$0xff]  ;;  %s460_s30 = scalar_lea.hbm %s982_s4, %s623_s14  ;;  %s256_s5 = scalar_lea.vmem [#allocation4], %s584_s23 }
  0x1f   : > { %309 = vmatpush.bf16.msra.mxu0 %v629_v2  ;;  %s462_s6 = sshll.u32 %s256_s5, 4  ;;  %s464_s8 = sshll.u32 %s460_s30, 4  ;;  %s463_s6 = int_to_ptr.vmem [resolvable:$true] %s462_s6  ;;  %s465_s8 = int_to_ptr.hbm [resolvable:$true] %s464_s8 }
  0x20   : > { %382 = vmatpush.bf16.msra.mxu2 %v633_v3  ;;  %s447_s9 = scalar_lea.sflag [#allocation5], %s254_s13  ;;  %s724_s19 = sshra.s32 %s465_s8, 4  ;;  %s725_s19 = int_to_ptr.hbm [resolvable:$true] %s724_s19 }
  0x21   : > { %341 = vmatpush.bf16.msra.mxu1 %v631_v15  ;;  %s726_s18 = scalar_lea.hbm %s725_s19, 4  ;;  %s730_s12 = scalar_lea.hbm %s982_s4, 32 }
  0x22   : > { %600 = vmatmul.msk.bf16.vlgmr.msra.gmra.mxu0 %vm298_vm0, %v281_v4  ;;  %p727_p0 = scmp.ne.s32.totalorder %s725_s19, %s726_s18  ;;  %p731_p4 = scmp.lt.s32.totalorder %s725_s19, %s982_s4 }
  0x23   : > { %618 = vmatmul.msk.bf16.vlgmr.msra.gmra.mxu2 %vm298_vm0, %v354_v5  ;;  %p732_p5 = scmp.lt.s32.totalorder %s730_s12, %s726_s18 }
  0x24   : > { %609 = vmatmul.msk.bf16.vlgmr.msra.gmra.mxu1 %vm298_vm0, %v281_v4  ;;  %p728_p1 = pnand %p727_p0, %p882_p3 }
  0x25   : > { %p733_p6 = por %p732_p5, %p731_p4 }
  0x26   : > { %p729_p2 = pneg %p728_p1 }
  0x28   : > { %p734_p7 = pnand %p733_p6, %p729_p2 }
  0x9f   : > { %v311_v6 = vpop.f32.mrf.mxu0 }
  0xa0   : > { %v315_v7 = vpack.c.bf16 %v311_v6, %v311_v6 }
  0xa1   : > { %v343_v19 = vpop.f32.mrf.mxu1 }
  0xa2   : > { %317 = vst.msk [vmem:[#allocation2] sm:$0xf] %vm316_vm1, %v315_v7  ;;  %v347_v20 = vpack.c.bf16 %v343_v19, %v343_v19 }
  0xa4   : > { %348 = vst.msk [vmem:[#allocation3] sm:$0xf] %vm316_vm1, %v347_v20 }
  0xa6   : > { %v384_v8 = vpop.f32.mrf.mxu2 }
  0xa7   : > { %v313_v9 = vpop.f32.mrf.mxu0  ;;  %v388_v13 = vpack.c.bf16 %v384_v8, %v384_v8 }
  0xa9   : > { %v389_v10 = vld [vmem:[#allocation2] sm:$0xf]  ;;  %v345_v23 = vpop.f32.mrf.mxu1 }
  0xaa   : > { %v395_v11 = vsel %vm390_vm2, %v389_v10, 0 }
  0xab   : > { %404 = vmatpush.bf16.xpose.msra.mxu3 %v395_v11  ;;  %v422_v25 = vld [vmem:[#allocation3] sm:$0xf] }
  0xac   : > { %v428_v26 = vsel %vm426_vm3, %v422_v25, 0 }
  0xad   : > { %437 = vmatpush.bf16.msrb.mxu0 %v428_v26 }
  0xae   : > { %v386_v12 = vpop.f32.mrf.mxu2 }
  0xb2   : > { %619 = vmatmul.msk.bf16.vlgmr.msra.gmra.mxu3 %vm390_vm2, %v388_v13 }
 0x135   : > { %v406_v16 = vpop.f32.mrf.mxu3 }
 0x136   : > { %v410_v17 = vsel %vm390_vm2, %v406_v16, -inf }
 0x137   : > { %411 = vmax.xlane.f32.xlu0 %v410_v17 }
 0x13d   : > { %v408_v18 = vpop.f32.mrf.mxu3 }
 0x1aa   : > { %v412_v21 = vpop.xlane.xlu0 %411 }
 0x1ab   : > { %v413_v22 = vsub.f32 %v406_v16, %v412_v21 }
 0x1ad   : > { %v414_v24 = vmul.f32 1.442695, %v413_v22 }
 0x1af   : > { %706 = vpow2.f32 %v414_v24 }
 0x1b5   : > { %v707_v27 = vpop.eup %706 }
 0x1b6   : > { %v416_v28 = vsel %vm390_vm2, %v707_v27, 0.0 }
 0x1b7   : > { %417 = vadd.xlane.f32.xlu0 %v416_v28 }
 0x22a   : > { %v418_v29 = vpop.xlane.xlu0 %417 }
 0x22b   : > { %708 = vrcp.f32 %v418_v29 }
 0x231   : > { %v709_v30 = vpop.eup %708 }
 0x232   : > { %v420_v31 = vmul.f32 %v709_v30, %v707_v27 }
 0x234   : > { %v421_v32 = vpack.c.bf16 %v420_v31, %v420_v31 }
 0x236   : > { %620 = vmatmul.msk.bf16.vlgmr.msrb.gmra.mxu0 %vm390_vm2, %v421_v32 }
 0x2b3   : > { %v439_v33 = vpop.f32.mrf.mxu0 }
 0x2b4   : > { %v443_v34 = vpack.c.bf16 %v439_v33, %v439_v33 }
 0x2b6   : > { %445 = vst.msk [vmem:[%s256_s5] sm:$0xf] %vm316_vm1, %v443_v34 }
 0x2b7   : > { %737 = shalt.err (!%p734_p7)
}
 0x2b8   : > { %635 = dma.vmem_to_hbm [thread:$0]  (%p882_p3), %s463_s6, 64, %s465_s8, %s447_s9  }
 0x2bb   : > { %v441_v35 = vpop.f32.mrf.mxu0 }
 0x2bc PF: > { %p641_p9 = scmp.ge.s32.totalorder %s804_s22, 2  ;;  %s476_s13 = sand.u32 1, %s776_s15  }
 0x2bd   : > { %s477_s24 = scalar_lea.sflag [#allocation5], %s476_s13 }
 0x2be   : > { %p638_p10 = pnand %p641_p9, %p891_p8 }
 0x2c0   : > { %p639_p11 = pneg %p638_p10 }
 0x2c2   : > { %771 = dma.done.wait (%p639_p11), %s477_s24, 64  }
 0x2c3   : > { %773 = vsyncadd (%p639_p11), %s477_s24, 4294967232  ;;  %s17_s22 = sadd.s32 1, %s804_s22   ;;  %s985_s15 = smov %s780_s16 }
 0x2c4   : > { %p14_p12 = scmp.ge.s32.totalorder %s17_s22, 10   ;;  %s986_s16 = smov %s784_s17 }
 0x2c5   : > { %s987_s17 = smov %s900_s7  ;;  %s988_s18 = smov %s796_s20 }
 0x2c6   : > { %s989_s19 = smov %s800_s21  ;;  %s990_s20 = smov %s993_s25 }
 0x2c7   : > { %s991_s21 = smov %s997_s26  ;;  %16 = sbr.rel (!%p14_p12) target bundleno = 5 (0x5), region = 85 }
 0x2cc   :  { %483 = vsyncpa [#allocation5], 1 }
 0x2cd   :  { %485 = vsyncpa [#allocation5 + $0x1], 1 }

</bundles_post_ra>
